<compile_context>
chip_gen: v6e
topology: v6e:2x2x1
jax: 0.10.0
libtpu: 0.0.40
codegen_flags: <defaults>
</compile_context>

<pallas_src>
import functools
import numpy as np

import jax
import jax.numpy as jnp
from jax.experimental import pallas as pl
from jax.experimental.pallas import tpu as pltpu

MV_DIM = 16

# ----------------------------------------------------------------------------
# Projective geometric algebra G(3,0,1) tables (blade operator, geometric
# product, join, inner-product coordinate set).  These helpers are external to
# the PyTorch module; they are re-derived here deterministically.
# ----------------------------------------------------------------------------
_BLADE_BITS = [
    0b0000,
    0b0001, 0b0010, 0b0100, 0b1000,
    0b0011, 0b0101, 0b1001, 0b0110, 0b1010, 0b1100,
    0b0111, 0b1011, 0b1101, 0b1110,
    0b1111,
]
_BITS_TO_IDX = {b: i for i, b in enumerate(_BLADE_BITS)}
_METRIC = [0.0, 1.0, 1.0, 1.0]  # e0^2 = 0, e1..e3 ^2 = 1


def _grade(bits):
    return bin(bits).count("1")


def _reorder_sign(a, b):
    a >>= 1
    total = 0
    while a:
        total += bin(a & b).count("1")
        a >>= 1
    return 1.0 if total % 2 == 0 else -1.0


def _build_geometric_product():
    g = np.zeros((MV_DIM, MV_DIM, MV_DIM), dtype=np.float32)
    for a in _BLADE_BITS:
        for b in _BLADE_BITS:
            scale = _reorder_sign(a, b)
            common = a & b
            for i in range(4):
                if common & (1 << i):
                    scale *= _METRIC[i]
            if scale != 0.0:
                g[_BITS_TO_IDX[a ^ b], _BITS_TO_IDX[a], _BITS_TO_IDX[b]] += scale
    return g


def _build_join():
    # join(x, y) = undual(dual(x) ^ dual(y))  (right-complement dual convention)
    j = np.zeros((MV_DIM, MV_DIM, MV_DIM), dtype=np.float32)

    def dual(a):
        c = 0b1111 ^ a
        return c, _reorder_sign(a, c)

    for a in _BLADE_BITS:
        ca, sa = dual(a)
        for b in _BLADE_BITS:
            cb, sb = dual(b)
            if ca & cb:
                continue
            w = ca | cb
            sw = _reorder_sign(ca, cb)
            a0 = 0b1111 ^ w
            s0 = _reorder_sign(a0, w)
            j[_BITS_TO_IDX[a0], _BITS_TO_IDX[a], _BITS_TO_IDX[b]] += sa * sb * sw * s0
    return j


def _build_blade_operator(gp):
    # 9 Pin(3,0,1)-equivariant basis maps: 5 grade projections + e0 * (grade-k
    # projection) for k=0..3.  blade[b][x, y] maps input coord x to output y.
    maps = []
    for k in range(5):
        m = np.zeros((MV_DIM, MV_DIM), dtype=np.float32)
        for i, bits in enumerate(_BLADE_BITS):
            if _grade(bits) == k:
                m[i, i] = 1.0
        maps.append(m)
    e0_idx = _BITS_TO_IDX[0b0001]
    left_e0 = gp[:, e0_idx, :]
    for k in range(4):
        m = np.zeros((MV_DIM, MV_DIM), dtype=np.float32)
        for z, bits in enumerate(_BLADE_BITS):
            if _grade(bits) == k:
                m[z, :] = left_e0[:, z]
        maps.append(m)
    return np.stack(maps, axis=0)  # (9, 16, 16)


# Non-degenerate (no-e0) components used by faster_inner_product / attention q,k.
_IP_IDXS = [i for i, b in enumerate(_BLADE_BITS) if (b & 1) == 0]  # 8 coords


def _pick_tile(n, candidates):
    for c in candidates:
        if n % c == 0:
            return c
    return n  # full extent fallback (always legal as a BlockSpec dim)


# ----------------------------------------------------------------------------
# Pallas kernels
# ----------------------------------------------------------------------------
def _matmul_kernel(x_ref, w_ref, o_ref):
    o_ref[...] = jnp.dot(x_ref[...], w_ref[...], preferred_element_type=jnp.float32)


def pallas_matmul(x2d, w2d_bf16):
    """x2d: (M, K) f32/bf16, w2d_bf16: (K, N) bf16 -> (M, N) f32.

    Tiled over (M, N) with both axes 'parallel'; full K resident (K <= 256 here,
    no accumulation axis needed).  bf16 MXU inputs, f32 accumulation.
    """
    x = x2d.astype(jnp.bfloat16)
    m, k = x.shape
    n = w2d_bf16.shape[1]
    tm = _pick_tile(m, (256, 128, 64, 32, 16, 8))
    tn = _pick_tile(n, (512, 256, 128))
    return pl.pallas_call(
        _matmul_kernel,
        out_shape=jax.ShapeDtypeStruct((m, n), jnp.float32),
        grid=(m // tm, n // tn),
        in_specs=[
            pl.BlockSpec((tm, k), lambda i, j: (i, 0)),
            pl.BlockSpec((k, tn), lambda i, j: (0, j)),
        ],
        out_specs=pl.BlockSpec((tm, tn), lambda i, j: (i, j)),
        compiler_params=pltpu.CompilerParams(
            dimension_semantics=("parallel", "parallel")),
    )(x, w2d_bf16)


def _norm_kernel(x_ref, o_ref, *, inv_c):
    x = x_ref[...]                                            # (TR, C*16) f32
    # Inner-product mask (non-e0 blades {0,2,3,4,8,9,10,14}) built from iota:
    lane = jax.lax.broadcasted_iota(jnp.int32, x.shape, 1) & (MV_DIM - 1)
    mask = ((lane == 0) | (lane == 2) | (lane == 3) | (lane == 4)
            | (lane == 8) | (lane == 9) | (lane == 10) | (lane == 14))
    ip = jnp.sum(jnp.where(mask, x * x, 0.0), axis=-1, keepdims=True)  # (TR, 1)
    o_ref[...] = x * jax.lax.rsqrt(ip * inv_c)


def equi_norm2d(x2d, channels):
    """EquilinearNormLayer on a flattened (rows, channels*16) layout.

    sum of <x,x> over all (channel, mv) lanes / channels == channel-mean of the
    per-channel inner products; the rsqrt broadcast then matches x / sqrt(mean).
    """
    rows, width = x2d.shape
    tr = _pick_tile(rows, (1024, 512, 256, 128, 64, 32, 16, 8))
    return pl.pallas_call(
        functools.partial(_norm_kernel, inv_c=1.0 / float(channels)),
        out_shape=jax.ShapeDtypeStruct((rows, width), jnp.float32),
        grid=(rows // tr,),
        in_specs=[pl.BlockSpec((tr, width), lambda i: (i, 0))],
        out_specs=pl.BlockSpec((tr, width), lambda i: (i, 0)),
        compiler_params=pltpu.CompilerParams(dimension_semantics=("parallel",)),
    )(x2d)


def _attn_kernel(q_ref, k_ref, v_ref, o_ref):
    q = q_ref[...]                               # (heads*N, Dq) bf16, pre-scaled
    k = k_ref[...]                               # (N, Dq) bf16 (shared per head)
    v = v_ref[...]                               # (N, Dv) bf16
    s = jax.lax.dot_general(q, k, (((1,), (1,)), ((), ())),
                            preferred_element_type=jnp.float32)
    s = s - jnp.max(s, axis=-1, keepdims=True)
    p = jnp.exp(s)
    p = p * pl.reciprocal(jnp.sum(p, axis=-1, keepdims=True), approx=True)
    o_ref[...] = jnp.dot(p.astype(v.dtype), v, preferred_element_type=jnp.float32)


def pallas_sdpa(q, k, v):
    """Multi-query attention with heads collapsed into the Q row dimension.

    q: (B, heads*N, Dq) already scaled by 1/sqrt(Dq); k: (B, N, Dq); v: (B, N, Dv).
    One block per batch; K/V shared across all heads (multi-query broadcast).
    """
    b, hn, dq = q.shape
    n = k.shape[1]
    dv = v.shape[-1]
    qb = q.astype(jnp.bfloat16)
    kb = k.astype(jnp.bfloat16)
    vb = v.astype(jnp.bfloat16)
    sq = pl.Squeezed()
    return pl.pallas_call(
        _attn_kernel,
        out_shape=jax.ShapeDtypeStruct((b, hn, dv), jnp.float32),
        grid=(b,),
        in_specs=[
            pl.BlockSpec((sq, hn, dq), lambda bi: (bi, 0, 0)),
            pl.BlockSpec((sq, n, dq), lambda bi: (bi, 0, 0)),
            pl.BlockSpec((sq, n, dv), lambda bi: (bi, 0, 0)),
        ],
        out_specs=pl.BlockSpec((sq, hn, dv), lambda bi: (bi, 0, 0)),
        compiler_params=pltpu.CompilerParams(dimension_semantics=("parallel",)),
    )(qb, kb, vb)


# ----------------------------------------------------------------------------
# Model pieces (glue in plain JAX, hot paths via the kernels above)
# ----------------------------------------------------------------------------
def embed_point(points):
    """(B, N, 3) -> (B, N, 16) PGA point embedding (trivector + unit e123)."""
    b, nit, _ = points.shape
    mv = jnp.zeros((b, nit, MV_DIM), jnp.float32)
    mv = mv.at[..., 14].set(1.0)                 # e123
    mv = mv.at[..., 13].set(points[..., 0])      # e023
    mv = mv.at[..., 12].set(-points[..., 1])     # e013
    mv = mv.at[..., 11].set(points[..., 2])      # e012
    return mv


def init_params(key, hidden_dim, n_heads, blade_len):
    names_shapes = [
        ("enter", (hidden_dim, 16, blade_len)),
        ("q", (hidden_dim * n_heads, hidden_dim, blade_len)),
        ("k", (hidden_dim, hidden_dim, blade_len)),
        ("v", (hidden_dim, hidden_dim, blade_len)),
        ("out_proj", (hidden_dim, hidden_dim * n_heads, blade_len)),
        ("geom1", (hidden_dim // 2, hidden_dim, blade_len)),
        ("geom2", (hidden_dim // 2, hidden_dim, blade_len)),
        ("join1", (hidden_dim // 2, hidden_dim, blade_len)),
        ("join2", (hidden_dim // 2, hidden_dim, blade_len)),
        ("gelu", (hidden_dim, hidden_dim, blade_len)),
        ("final", (256, hidden_dim, blade_len)),
    ]
    keys = jax.random.split(key, len(names_shapes))
    # torch.rand -> uniform [0, 1)
    return {n: jax.random.uniform(k, s, jnp.float32)
            for k, (n, s) in zip(keys, names_shapes)}
    # NOTE: token_pooling / project_to_folding / reduce_dim are dead code in the
    # PyTorch forward (after the first return) and are intentionally omitted.


def _fold_weight(w, blade):
    """EquiLinear weights (Cout, Cin, B) -> folded dense matrix (Cin*16, Cout*16)."""
    cout, cin, _ = w.shape
    m = jnp.einsum("jib,bxy->jixy", w, blade)                   # (J, I, 16, 16)
    return m.transpose(1, 2, 0, 3).reshape(cin * MV_DIM, cout * MV_DIM)


def fold_params(params, blade):
    """Fold all EquiLinear layers once (outside the forward) and fuse shared-input
    layers along the output-column axis: (q|k|v) and (geom1|geom2|join1|join2)."""
    f = {n: _fold_weight(params[n], blade) for n in params}
    folded = {
        "enter": f["enter"],
        "qkv": jnp.concatenate([f["q"], f["k"], f["v"]], axis=1),
        "out_proj": f["out_proj"],
        "bilinear": jnp.concatenate(
            [f["geom1"], f["geom2"], f["join1"], f["join2"]], axis=1),
        "gelu": f["gelu"],
        "final": f["final"],
    }
    return {k: v.astype(jnp.bfloat16) for k, v in folded.items()}


def gatr_forward(folded, point_cloud, gp_t, join_t, *, hidden_dim, n_heads):
    h = hidden_dim
    emb = embed_point(point_cloud)                 # (B, N, 16)
    b, nit = emb.shape[0], emb.shape[1]
    rows = b * nit

    # TODO(synk): the PyTorch module builds GATrNet with in_channels=16 while the
    # embedding produces a single mv channel; we tile to 16 identical channels so
    # the declared EquiLinear weight shapes hold (same departure as before).
    emb2d = emb.reshape(rows, MV_DIM)
    x2d = jnp.tile(emb2d, (1, 16))                 # (rows, 16*16)

    proj2d = pallas_matmul(x2d, folded["enter"])   # (rows, h*16)
    normed2d = equi_norm2d(proj2d, h)

    # --- geometric attention (fused q/k/v matmul) ---
    qkv2d = pallas_matmul(normed2d, folded["qkv"])        # (rows, (h*heads+2h)*16)
    dq_cols = h * n_heads * MV_DIM
    dk_cols = h * MV_DIM
    q2d = qkv2d[:, :dq_cols]
    k2d = qkv2d[:, dq_cols:dq_cols + dk_cols]
    v2d = qkv2d[:, dq_cols + dk_cols:]

    coords = np.array(_IP_IDXS)
    n_ip = len(_IP_IDXS)
    # channel axis of q is (hidden_dim, n_heads) with hidden outer, heads inner
    qh = q2d.reshape(b, nit, h, n_heads, MV_DIM).transpose(0, 3, 1, 2, 4)
    kh = k2d.reshape(b, nit, h, MV_DIM)
    vh = v2d.reshape(b, nit, h, MV_DIM)

    dq = h * n_ip
    scale = 1.0 / float(np.sqrt(dq))
    q_in = (qh[..., coords].reshape(b, n_heads * nit, dq)) * scale
    k_in = kh[..., coords].reshape(b, nit, dq)
    v_in = vh.reshape(b, nit, h * MV_DIM)

    attn = pallas_sdpa(q_in, k_in, v_in)                  # (B, heads*N, h*16)
    attn_mv = attn.reshape(b, n_heads, nit, h, MV_DIM).transpose(0, 2, 1, 3, 4)
    attn2d = attn_mv.reshape(rows, n_heads * h * MV_DIM)

    attended2d = pallas_matmul(attn2d, folded["out_proj"])  # (rows, h*16)
    residual1 = attended2d + proj2d
    normed_res = equi_norm2d(residual1, h)

    # --- geometric bilinear (fused geom1/geom2/join1/join2 matmul) ---
    bil2d = pallas_matmul(normed_res, folded["bilinear"])   # (rows, 4*(h/2)*16)
    half = h // 2
    chunk = half * MV_DIM
    g1 = bil2d[:, 0 * chunk:1 * chunk].reshape(b, nit, half, MV_DIM)
    g2 = bil2d[:, 1 * chunk:2 * chunk].reshape(b, nit, half, MV_DIM)
    j1 = bil2d[:, 2 * chunk:3 * chunk].reshape(b, nit, half, MV_DIM)
    j2 = bil2d[:, 3 * chunk:4 * chunk].reshape(b, nit, half, MV_DIM)

    # TODO(synk): the 16x16x16 geometric-product / join bilinears stay in XLA;
    # folding them into the fused bilinear Pallas kernel needs a lane-dense
    # relayout of the (channel, x, y) contraction that is not implemented here.
    reference = jnp.mean(emb, axis=1, keepdims=True)[:, :, None, :]  # (B,1,1,16)
    geom = jnp.einsum("yxz,...x,...z->...y", gp_t, g1, g2) * 1e-5
    # TODO(synk): the external `join(x, y, ref)` helper is not in the spec; we
    # gate by the reference pseudoscalar (e0123) component as in GATr's EquiJoin.
    joined = reference[..., 15:16] * jnp.einsum("yxz,...x,...z->...y", join_t, j1, j2)
    bilinear = jnp.concatenate([geom, joined], axis=-2)     # (B, N, h, 16)

    # gated ReLU
    gated = jnp.maximum(bilinear[..., 0:1], 0.0) * bilinear
    gated2d = gated.reshape(rows, h * MV_DIM)

    proj_bil2d = pallas_matmul(gated2d, folded["gelu"])     # (rows, h*16)
    residual2 = proj_bil2d + residual1
    out2d = pallas_matmul(residual2, folded["final"])       # (rows, 256*16)
    return out2d.reshape(b, nit, 256, MV_DIM)


# ----------------------------------------------------------------------------
if __name__ == "__main__":
    hidden_dim = 8
    n_heads = 2
    batch, n_points = 2, 16

    gp_np = _build_geometric_product()
    join_np = _build_join()
    blade_np = _build_blade_operator(gp_np)
    blade_len = blade_np.shape[0]

    key = jax.random.PRNGKey(0)
    pkey, xkey = jax.random.split(key)
    params = init_params(pkey, hidden_dim, n_heads, blade_len)
    point_cloud = jax.random.normal(xkey, (batch, n_points, 3), jnp.float32)

    blade = jnp.asarray(blade_np)
    gp_t = jnp.asarray(gp_np)
    join_t = jnp.asarray(join_np)

    # Fold EquiLinear weights once (outside the jitted forward), cast to bf16.
    folded = fold_params(params, blade)

    # --- kernel sanity checks against plain-JAX references ---
    xa = jax.random.normal(jax.random.PRNGKey(1), (32, 128), jnp.float32)
    wb = jax.random.normal(jax.random.PRNGKey(2), (128, 256), jnp.float32)
    wb_bf = wb.astype(jnp.bfloat16)
    got_mm = pallas_matmul(xa, wb_bf)
    ref_mm = jnp.dot(xa.astype(jnp.bfloat16).astype(jnp.float32),
                     wb_bf.astype(jnp.float32))
    np.testing.assert_allclose(np.asarray(got_mm), np.asarray(ref_mm),
                               rtol=5e-3, atol=5e-3)

    xn = jax.random.normal(jax.random.PRNGKey(3), (32, 128), jnp.float32)
    mask16 = np.zeros((MV_DIM,), np.float32)
    mask16[_IP_IDXS] = 1.0
    xm = xn.reshape(32, 8, MV_DIM)
    ip_ref = jnp.sum(xm * xm * mask16, axis=-1, keepdims=True)
    sq_ref = jnp.mean(ip_ref, axis=-2, keepdims=True)
    ref_norm = (xm / jnp.sqrt(sq_ref)).reshape(32, 128)
    got_norm = equi_norm2d(xn, 8)
    np.testing.assert_allclose(np.asarray(got_norm), np.asarray(ref_norm),
                               rtol=1e-4, atol=1e-4)

    fwd = jax.jit(functools.partial(gatr_forward, hidden_dim=hidden_dim,
                                    n_heads=n_heads))
    out = fwd(folded, point_cloud, gp_t, join_t)
    out = jax.block_until_ready(out)

    assert out.shape == (batch, n_points, 256, MV_DIM), out.shape
    assert bool(jnp.all(jnp.isfinite(out)))
    print("KERNEL_OK")
</pallas_src>

<mosaic_0001>
module attributes {stable_mosaic.version = 11 : i64} {
  func.func @_matmul_kernel(%arg0: i32, %arg1: i32, %arg2: memref<32x128xbf16, #tpu.memory_space<vmem>>, %arg3: memref<128x256xbf16, #tpu.memory_space<vmem>>, %arg4: memref<32x256xf32, #tpu.memory_space<vmem>>) attributes {dimension_semantics = [#tpu.dimension_semantics<parallel>, #tpu.dimension_semantics<parallel>], iteration_bounds = array<i64: 1, 1>, scalar_prefetch = 0 : i64, scratch_operands = 0 : i64, tpu.core_type = #tpu.core_type<tc>, window_params = [{transform_indices = @transform_0, window_bounds = array<i64: 32, 128>}, {transform_indices = @transform_1, window_bounds = array<i64: 128, 256>}, {transform_indices = @transform_2, window_bounds = array<i64: 32, 256>}]} {
    %c0 = arith.constant 0 : index
    %c0_0 = arith.constant 0 : index
    %0 = vector.load %arg2[%c0, %c0_0] : memref<32x128xbf16, #tpu.memory_space<vmem>>, vector<32x128xbf16>
    %c0_1 = arith.constant 0 : index
    %c0_2 = arith.constant 0 : index
    %1 = vector.load %arg3[%c0_1, %c0_2] : memref<128x256xbf16, #tpu.memory_space<vmem>>, vector<128x256xbf16>
    %cst = arith.constant dense<0.000000e+00> : vector<32x256xf32>
    %2 = tpu.matmul %0, %1, %cst {dimension_numbers = #tpu.dot_dimension_numbers<[1], [0], [0], [1], [0, 0, 1, 1], [], []>} : vector<32x128xbf16>, vector<128x256xbf16>, vector<32x256xf32> -> vector<32x256xf32>
    %c0_3 = arith.constant 0 : index
    %c0_4 = arith.constant 0 : index
    %3 = vector.load %arg4[%c0_3, %c0_4] : memref<32x256xf32, #tpu.memory_space<vmem>>, vector<32x256xf32>
    tpu.vector_store %arg4[%c0_3, %c0_4], %2 {strides = array<i32>} : memref<32x256xf32, #tpu.memory_space<vmem>>, vector<32x256xf32>,
    return
  }
  func.func @transform_0(%arg0: i32, %arg1: i32) -> (i32, i32) {
    %c0_i32 = arith.constant 0 : i32
    %c0_i32_0 = arith.constant 0 : i32
    return %arg0, %c0_i32 : i32, i32
  }
  func.func @transform_1(%arg0: i32, %arg1: i32) -> (i32, i32) {
    %c0_i32 = arith.constant 0 : i32
    %c0_i32_0 = arith.constant 0 : i32
    return %c0_i32, %arg1 : i32, i32
  }
  func.func @transform_2(%arg0: i32, %arg1: i32) -> (i32, i32) {
    %c0_i32 = arith.constant 0 : i32
    return %arg0, %arg1 : i32, i32
  }
}

</mosaic_0001>

<bundles_post_ra>
// kernel: tpu_custom_call.1
= control target key start
LH: loop header
LB: loop body
LE: loop exit
PB: predicated region body
PF: predicated region fallthrough
CT: control target
= control target key end

     0   :  { %7 = vsyncpa [#allocation3], 0  ;;  %s402_s0 = inlined_call_operand.hbm [shape: bf16[32,128], index: 0, kind: input, shape index: {}]   ;;  %s403_s1 = inlined_call_operand.hbm [shape: bf16[128,256], index: 1, kind: input, shape index: {}]   ;;  %s404_s2 = inlined_call_operand.hbm [shape: f32[32,256], index: 2, kind: output, shape index: {}]  }
   0x1   :  { %8 = vsyncpa [#allocation6], 0 }
   0x2   :  { %9 = vsyncpa [#allocation4], 0  ;;  %s368_s9 = smov [#allocation2]  }
   0x3   :  { %s15_s10 = sshll.u32 %s368_s9, 4  ;;  %s16_s10 = int_to_ptr.vmem [resolvable:$true] %s15_s10 }
   0x4   :  { %s310_s11 = scalar_lea.vmem %s16_s10, 256  ;;  %p315_p1 = scmp.lt.s32.totalorder %s16_s10, %s16_s10 }
   0x5   :  { %p311_p0 = scmp.ne.s32.totalorder %s16_s10, %s310_s11  ;;  %p316_p2 = scmp.lt.s32.totalorder %s310_s11, %s310_s11 }
   0x7   :  { %p317_p3 = por %p316_p2, %p315_p1 }
   0x9   :  { %p318_p4 = pnand %p317_p3, %p311_p0 }
   0xb   :  { %321 = shalt.err (!%p318_p4)
}
   0xc   :  { %s369_s12 = smov 64   ;;  %s370_s13 = smov 4  }
   0xd   :  { %21 = dma.hbm_to_vmem [thread:$0]  %s402_s0, 256, %s16_s10, [#allocation3], %s369_s12, %s369_s12, %s370_s13  }
   0xe   :  { %s371_s16 = smov [#allocation5]  }
   0xf   :  { %s27_s17 = sshll.u32 %s371_s16, 4  ;;  %s28_s17 = int_to_ptr.vmem [resolvable:$true] %s27_s17 }
  0x10   :  { %s330_s18 = scalar_lea.vmem %s28_s17, 2048  ;;  %p335_p6 = scmp.lt.s32.totalorder %s28_s17, %s28_s17 }
  0x11   :  { %p331_p5 = scmp.ne.s32.totalorder %s28_s17, %s330_s18  ;;  %p336_p7 = scmp.lt.s32.totalorder %s330_s18, %s330_s18 }
  0x13   :  { %p337_p8 = por %p336_p7, %p335_p6 }
  0x15   :  { %p338_p9 = pnand %p337_p8, %p331_p5 }
  0x17   :  { %341 = shalt.err (!%p338_p9)
}
  0x18   :  { %s372_s19 = smov 128   ;;  %s373_s20 = smov 8  }
  0x19   :  { %33 = dma.hbm_to_vmem [thread:$0]  %s403_s1, 2048, %s28_s17, [#allocation6], %s372_s19, %s372_s19, %s373_s20  }
  0x1a   :  { %362 = dma.done.wait [#allocation3], 256  }
  0x1b   :  { %363 = vsyncadd [#allocation3], 4294967040 }
  0x1c   :  { %364 = dma.done.wait [#allocation6], 2048  }
  0x1d   :  { %365 = vsyncadd [#allocation6], 4294965248  ;;  %v374_v0 = vmov 0   ;;  %v276_v1 = vld [vmem:[#allocation5 + $0x74] ss:$8 sps:$4 sm:$0xff]   ;;  %s375_s0 = smov [#allocation7]  }
  0x1e   :  { %185 = vmatprep.mubr.bf16.mxu0 %v374_v0  ;;  %195 = vmatprep.mubr.bf16.mxu1 %v374_v0  ;;  %v278_v2 = vld [vmem:[#allocation5 + $0x70] ss:$8 sps:$4 sm:$0xff]   ;;  %v279_v3 = vld [vmem:[#allocation5 + $0x64] ss:$8 sps:$4 sm:$0xff]   ;;  %v281_v4 = vld [vmem:[#allocation5 + $0x60] ss:$8 sps:$4 sm:$0xff]  }
  0x1f   :  { %153 = vmatprep.subr.bf16.mxu0 %v276_v1  ;;  %250 = vmatprep.subr.bf16.mxu1 %v276_v1  ;;  %v282_v5 = vld [vmem:[#allocation5 + $0x54] ss:$8 sps:$4 sm:$0xff]   ;;  %v284_v6 = vld [vmem:[#allocation5 + $0x50] ss:$8 sps:$4 sm:$0xff]   ;;  %v285_v7 = vld [vmem:[#allocation5 + $0x44] ss:$8 sps:$4 sm:$0xff]  }
  0x20   :  { %154 = vmatpush1.bf16.msra.mxu0 %v278_v2  ;;  %258 = vmatpush1.bf16.msra.mxu1 %v278_v2  ;;  %v287_v8 = vld [vmem:[#allocation5 + $0x40] ss:$8 sps:$4 sm:$0xff]   ;;  %v288_v9 = vld [vmem:[#allocation5 + $0x34] ss:$8 sps:$4 sm:$0xff]   ;;  %v290_v10 = vld [vmem:[#allocation5 + $0x30] ss:$8 sps:$4 sm:$0xff]  }
  0x21   :  { %155 = vmatprep.subr.bf16.mxu0 %v279_v3  ;;  %251 = vmatprep.subr.bf16.mxu1 %v279_v3  ;;  %v291_v11 = vld [vmem:[#allocation5 + $0x24] ss:$8 sps:$4 sm:$0xff]   ;;  %v293_v12 = vld [vmem:[#allocation5 + $0x20] ss:$8 sps:$4 sm:$0xff]   ;;  %v294_v13 = vld [vmem:[#allocation5 + $0x14] ss:$8 sps:$4 sm:$0xff]  }
  0x22   :  { %v296_v14 = vld [vmem:[#allocation5 + $0x10] ss:$8 sps:$4 sm:$0xff]   ;;  %v297_v15 = vld [vmem:[#allocation5 + $0x4] ss:$8 sps:$4 sm:$0xff]   ;;  %v299_v16 = vld [vmem:[#allocation5] ss:$8 sps:$4 sm:$0xff]  }
  0x23   :  { %v300_v17 = vld [vmem:[#allocation2] sm:$0xff]   ;;  %v301_v18 = vld [vmem:[#allocation2 + $0x8] sm:$0xff]   ;;  %s219_s1 = sshll.u32 %s375_s0, 4  ;;  %s220_s1 = int_to_ptr.vmem [resolvable:$true] %s219_s1 }
  0x24   :  { %156 = vmatpush1.bf16.msra.mxu0 %v281_v4  ;;  %259 = vmatpush1.bf16.msra.mxu1 %v281_v4  ;;  %s342_s23 = scalar_lea.vmem %s220_s1, 1024  ;;  %p347_p11 = scmp.lt.s32.totalorder %s220_s1, %s220_s1 }
  0x25   :  { %157 = vmatprep.subr.bf16.mxu0 %v282_v5  ;;  %252 = vmatprep.subr.bf16.mxu1 %v282_v5  ;;  %p343_p10 = scmp.ne.s32.totalorder %s220_s1, %s342_s23  ;;  %p348_p12 = scmp.lt.s32.totalorder %s342_s23, %s342_s23 }
  0x27   :  { %p349_p13 = por %p348_p12, %p347_p11 }
  0x28   :  { %158 = vmatpush1.bf16.msra.mxu0 %v284_v6  ;;  %260 = vmatpush1.bf16.msra.mxu1 %v284_v6 }
  0x29   :  { %159 = vmatprep.subr.bf16.mxu0 %v285_v7  ;;  %253 = vmatprep.subr.bf16.mxu1 %v285_v7  ;;  %p350_p0 = pnand %p349_p13, %p343_p10 }
  0x2c   :  { %160 = vmatpush1.bf16.msra.mxu0 %v287_v8  ;;  %261 = vmatpush1.bf16.msra.mxu1 %v287_v8 }
  0x2d   :  { %161 = vmatprep.subr.bf16.mxu0 %v288_v9  ;;  %254 = vmatprep.subr.bf16.mxu1 %v288_v9 }
  0x30   :  { %162 = vmatpush1.bf16.msra.mxu0 %v290_v10  ;;  %262 = vmatpush1.bf16.msra.mxu1 %v290_v10 }
  0x31   :  { %163 = vmatprep.subr.bf16.mxu0 %v291_v11  ;;  %255 = vmatprep.subr.bf16.mxu1 %v291_v11 }
  0x34   :  { %164 = vmatpush1.bf16.msra.mxu0 %v293_v12  ;;  %263 = vmatpush1.bf16.msra.mxu1 %v293_v12 }
  0x35   :  { %165 = vmatprep.subr.bf16.mxu0 %v294_v13  ;;  %256 = vmatprep.subr.bf16.mxu1 %v294_v13 }
  0x38   :  { %166 = vmatpush1.bf16.msra.mxu0 %v296_v14  ;;  %264 = vmatpush1.bf16.msra.mxu1 %v296_v14 }
  0x39   :  { %167 = vmatprep.subr.bf16.mxu0 %v297_v15  ;;  %257 = vmatprep.subr.bf16.mxu1 %v297_v15 }
  0x3c   :  { %168 = vmatpush1.bf16.msra.mxu0 %v299_v16  ;;  %265 = vmatpush1.bf16.msra.mxu1 %v299_v16 }
  0x3f   :  { %186 = vmatmul.mubr.bf16.vlgmr.msra.gmra.mxu0 %v300_v17  ;;  %196 = vmatmul.mubr.bf16.vlgmr.msra.gmra.mxu1 %v301_v18 }
  0xff   :  { %v187_v19 = vpop.f32.mrf.mxu0  ;;  %v197_v20 = vpop.f32.mrf.mxu1 }
 0x100   :  { %206 = vst [vmem:[#allocation7] sm:$0xff] %v187_v19  ;;  %210 = vst [vmem:[#allocation7 + $0x20] sm:$0xff] %v197_v20 }
 0x101   :  { %v189_v21 = vpop.f32.mrf.mxu0  ;;  %v199_v22 = vpop.f32.mrf.mxu1 }
 0x102   :  { %207 = vst [vmem:[#allocation7 + $0x8] sm:$0xff] %v189_v21  ;;  %211 = vst [vmem:[#allocation7 + $0x28] sm:$0xff] %v199_v22 }
 0x103   :  { %v191_v23 = vpop.f32.mrf.mxu0  ;;  %v201_v24 = vpop.f32.mrf.mxu1 }
 0x104   :  { %208 = vst [vmem:[#allocation7 + $0x10] sm:$0xff] %v191_v23  ;;  %212 = vst [vmem:[#allocation7 + $0x30] sm:$0xff] %v201_v24 }
 0x105   :  { %v193_v25 = vpop.f32.mrf.mxu0  ;;  %v203_v26 = vpop.f32.mrf.mxu1 }
 0x106   :  { %209 = vst [vmem:[#allocation7 + $0x18] sm:$0xff] %v193_v25  ;;  %213 = vst [vmem:[#allocation7 + $0x38] sm:$0xff] %v203_v26 }
 0x107   :  { %353 = shalt.err (!%p350_p0)
}
 0x108   :  { %s376_s24 = smov 256   ;;  %s377_s25 = smov 16  }
 0x109   :  { %225 = dma.vmem_to_hbm [thread:$0]  %s220_s1, 1024, %s404_s2, [#allocation4], %s376_s24, %s376_s24, %s377_s25  }
 0x10a   :  { %366 = dma.done.wait [#allocation4], 1024  }
 0x10b   :  { %367 = vsyncadd [#allocation4], 4294966272 }
 0x10c   :  { %229 = vsyncpa [#allocation3], 1 }
 0x10d   :  { %230 = vsyncpa [#allocation6], 1 }
 0x10e   :  { %231 = vsyncpa [#allocation4], 1 }

</bundles_post_ra>
